<compile_context>
chip_gen: v6e
topology: v6e:2x2x1
jax: 0.10.0
libtpu: 0.0.40
codegen_flags: <defaults>
</compile_context>

<pallas_src>
import functools
import math

import jax
import jax.numpy as jnp
from jax.experimental import pallas as pl
from jax.experimental.pallas import tpu as pltpu


def _round_up(x, m):
    return (x + m - 1) // m * m


def _cosine_kernel(x_ref, w_ref, o_ref, acc_ref, xsq_ref, wsq_ref, *, mxu_dtype):
    k = pl.program_id(2)

    @pl.when(k == 0)
    def _init():
        acc_ref[...] = jnp.zeros_like(acc_ref)
        xsq_ref[...] = jnp.zeros_like(xsq_ref)
        wsq_ref[...] = jnp.zeros_like(wsq_ref)

    x_raw = x_ref[...]          # (tb, tk)
    w_raw = w_ref[...]          # (tc, tk)
    xf = x_raw.astype(jnp.float32)
    wf = w_raw.astype(jnp.float32)

    # Per-batch-row sum of squares: lane-axis reduce (XLU) -> (tb, 1), already
    # in the row-broadcast orientation needed by the epilogue.
    xsq_ref[...] += jnp.sum(xf * xf, axis=1, keepdims=True)

    # Per-class sum of squares laid out along lanes: ones(8,tk) @ (W*W)^T on
    # the MXU gives (8, tc) with identical rows -> no transpose of the result.
    ones8 = jnp.ones((8, wf.shape[1]), jnp.float32)
    wsq_ref[...] += jax.lax.dot_general(
        ones8, wf * wf,
        dimension_numbers=(((1,), (1,)), ((), ())),
        preferred_element_type=jnp.float32)

    # Raw logits: transposed-RHS contraction (last axis of both operands);
    # W stays in its natural [C, F] layout, no in-kernel transpose.
    acc_ref[...] += jax.lax.dot_general(
        x_raw.astype(mxu_dtype), w_raw.astype(mxu_dtype),
        dimension_numbers=(((1,), (1,)), ((), ())),
        preferred_element_type=jnp.float32)

    @pl.when(k == pl.num_programs(2) - 1)
    def _finalize():
        inv_x = pl.reciprocal(jnp.sqrt(xsq_ref[...]) + 1e-4, approx=False)     # (tb, 1)
        inv_w = pl.reciprocal(jnp.sqrt(wsq_ref[0:1, :]) + 1e-4, approx=False)  # (1, tc)
        o_ref[...] = (acc_ref[...] * inv_x * inv_w).astype(o_ref.dtype)


def cosine_forward(x, w, *, tb=256, tc=256, tk=512, mxu_dtype=jnp.float32):
    """Cosine logits: (x/(||x||+1e-4)) @ (w/(||w||+1e-4)).T -> [B, C] float32."""
    B, F = x.shape
    C, F2 = w.shape
    assert F == F2, "in_features mismatch"

    # Shrink tiles for small problems while keeping hardware-friendly minimums:
    # output sublane tile multiple of 8; lane tiles multiples of 128 (lane-dense).
    tb = min(tb, _round_up(B, 8))
    tc = min(tc, _round_up(C, 128))
    tk = min(tk, _round_up(F, 128))

    Bp, Cp, Fp = _round_up(B, tb), _round_up(C, tc), _round_up(F, tk)
    if (Bp, Fp) != (B, F):
        x = jnp.pad(x, ((0, Bp - B), (0, Fp - F)))
    if (Cp, Fp) != (C, F):
        w = jnp.pad(w, ((0, Cp - C), (0, Fp - F)))

    grid = (Bp // tb, Cp // tc, Fp // tk)

    out = pl.pallas_call(
        functools.partial(_cosine_kernel, mxu_dtype=mxu_dtype),
        out_shape=jax.ShapeDtypeStruct((Bp, Cp), jnp.float32),
        grid_spec=pltpu.PrefetchScalarGridSpec(
            num_scalar_prefetch=0,
            grid=grid,
            in_specs=[
                pl.BlockSpec((tb, tk), lambda i, j, k: (i, k)),   # x tile
                pl.BlockSpec((tc, tk), lambda i, j, k: (j, k)),   # W tile
            ],
            out_specs=pl.BlockSpec((tb, tc), lambda i, j, k: (i, j)),
            scratch_shapes=[
                pltpu.VMEM((tb, tc), jnp.float32),   # logit accumulator
                pltpu.VMEM((tb, 1), jnp.float32),    # sum(x^2) per batch row
                pltpu.VMEM((8, tc), jnp.float32),    # sum(w^2) per class (lane-oriented)
            ],
        ),
        compiler_params=pltpu.CompilerParams(
            dimension_semantics=("parallel", "parallel", "arbitrary"),
            vmem_limit_bytes=32 * 1024 * 1024,
        ),
    )(x, w)

    if (Bp, Cp) != (B, C):
        out = out[:B, :C]
    return out


def init_weight(key, num_classes, in_features):
    # nn.init.kaiming_normal_(..., nonlinearity='relu'): std = sqrt(2)/sqrt(fan_in)
    std = math.sqrt(2.0) / math.sqrt(in_features)
    return std * jax.random.normal(key, (num_classes, in_features), dtype=jnp.float32)


def _reference(x, w):
    x_n = x / (jnp.linalg.norm(x, axis=1, keepdims=True) + 1e-4)
    w_n = w / (jnp.linalg.norm(w, axis=1, keepdims=True) + 1e-4)
    return x_n @ w_n.T


if __name__ == "__main__":
    key = jax.random.PRNGKey(0)
    k_x, k_w, k_x2, k_w2 = jax.random.split(key, 4)

    # Small demo shapes consistent with the module.
    batch, in_features, num_classes = 8, 32, 16
    x = jax.random.normal(k_x, (batch, in_features), dtype=jnp.float32)
    w = init_weight(k_w, num_classes, in_features)

    out = jax.block_until_ready(cosine_forward(x, w))
    assert out.shape == (batch, num_classes)
    assert jnp.allclose(out, _reference(x, w), atol=1e-5, rtol=1e-5)

    # Multi-tile check: exercises K accumulation, padding and the parallel grid.
    x2 = jax.random.normal(k_x2, (40, 1152), dtype=jnp.float32)
    w2 = init_weight(k_w2, 272, 1152)
    out2 = jax.block_until_ready(cosine_forward(x2, w2))
    assert out2.shape == (40, 272)
    assert jnp.allclose(out2, _reference(x2, w2), atol=1e-4, rtol=1e-5)

    print("KERNEL_OK")
</pallas_src>

<mosaic_0001>
module attributes {stable_mosaic.version = 11 : i64} {
  func.func @_cosine_kernel(%arg0: i32, %arg1: i32, %arg2: i32, %arg3: memref<8x128xf32, #tpu.memory_space<vmem>>, %arg4: memref<128x128xf32, #tpu.memory_space<vmem>>, %arg5: memref<8x128xf32, #tpu.memory_space<vmem>>, %arg6: memref<8x128xf32, #tpu.memory_space<vmem>>, %arg7: memref<8x1xf32, #tpu.memory_space<vmem>>, %arg8: memref<8x128xf32, #tpu.memory_space<vmem>>) attributes {dimension_semantics = [#tpu.dimension_semantics<parallel>, #tpu.dimension_semantics<parallel>, #tpu.dimension_semantics<arbitrary>], iteration_bounds = array<i64: 1, 1, 1>, scalar_prefetch = 0 : i64, scratch_operands = 3 : i64, tpu.core_type = #tpu.core_type<tc>, window_params = [{transform_indices = @transform_0, window_bounds = array<i64: 8, 128>}, {transform_indices = @transform_1, window_bounds = array<i64: 128, 128>}, {transform_indices = @transform_2, window_bounds = array<i64: 8, 128>}]} {
    %c0_i32 = arith.constant 0 : i32
    %0 = arith.cmpi eq, %arg2, %c0_i32 : i32
    %1 = arith.extui %0 : i1 to i32
    %c0_i32_0 = arith.constant 0 : i32
    %2 = arith.cmpi ne, %1, %c0_i32_0 : i32
    scf.if %2 {
      %cst_21 = arith.constant 0.000000e+00 : f32
      %24 = vector.broadcast %cst_21 : f32 to vector<8x128xf32>
      %c0_22 = arith.constant 0 : index
      %c0_23 = arith.constant 0 : index
      %25 = vector.load %arg6[%c0_22, %c0_23] : memref<8x128xf32, #tpu.memory_space<vmem>>, vector<8x128xf32>
      tpu.vector_store %arg6[%c0_22, %c0_23], %24 {strides = array<i32>} : memref<8x128xf32, #tpu.memory_space<vmem>>, vector<8x128xf32>,
      %cst_24 = arith.constant 0.000000e+00 : f32
      %26 = vector.broadcast %cst_24 : f32 to vector<8x1xf32>
      %c0_25 = arith.constant 0 : index
      %c0_26 = arith.constant 0 : index
      %27 = vector.load %arg7[%c0_25, %c0_26] : memref<8x1xf32, #tpu.memory_space<vmem>>, vector<8x1xf32>
      tpu.vector_store %arg7[%c0_25, %c0_26], %26 {strides = array<i32>} : memref<8x1xf32, #tpu.memory_space<vmem>>, vector<8x1xf32>,
      %cst_27 = arith.constant 0.000000e+00 : f32
      %28 = vector.broadcast %cst_27 : f32 to vector<8x128xf32>
      %c0_28 = arith.constant 0 : index
      %c0_29 = arith.constant 0 : index
      %29 = vector.load %arg8[%c0_28, %c0_29] : memref<8x128xf32, #tpu.memory_space<vmem>>, vector<8x128xf32>
      tpu.vector_store %arg8[%c0_28, %c0_29], %28 {strides = array<i32>} : memref<8x128xf32, #tpu.memory_space<vmem>>, vector<8x128xf32>,
    } else {
    }
    %c0 = arith.constant 0 : index
    %c0_1 = arith.constant 0 : index
    %3 = vector.load %arg3[%c0, %c0_1] : memref<8x128xf32, #tpu.memory_space<vmem>>, vector<8x128xf32>
    %c0_2 = arith.constant 0 : index
    %c0_3 = arith.constant 0 : index
    %4 = vector.load %arg4[%c0_2, %c0_3] : memref<128x128xf32, #tpu.memory_space<vmem>>, vector<128x128xf32>
    %c0_4 = arith.constant 0 : index
    %c0_5 = arith.constant 0 : index
    %5 = vector.load %arg7[%c0_4, %c0_5] : memref<8x1xf32, #tpu.memory_space<vmem>>, vector<8x1xf32>
    %6 = arith.mulf %3, %3 : vector<8x128xf32>
    %cst = arith.constant dense<0.000000e+00> : vector<8xf32>
    %7 = vector.multi_reduction <add>, %6, %cst [1] : vector<8x128xf32> to vector<8xf32>
    %8 = vector.shape_cast %7 : vector<8xf32> to vector<8x1xf32>
    %9 = arith.addf %5, %8 : vector<8x1xf32>
    %c0_6 = arith.constant 0 : index
    %c0_7 = arith.constant 0 : index
    %10 = vector.load %arg7[%c0_6, %c0_7] : memref<8x1xf32, #tpu.memory_space<vmem>>, vector<8x1xf32>
    tpu.vector_store %arg7[%c0_6, %c0_7], %9 {strides = array<i32>} : memref<8x1xf32, #tpu.memory_space<vmem>>, vector<8x1xf32>,
    %cst_8 = arith.constant 1.000000e+00 : f32
    %11 = vector.broadcast %cst_8 : f32 to vector<8x128xf32>
    %c0_9 = arith.constant 0 : index
    %c0_10 = arith.constant 0 : index
    %12 = vector.load %arg8[%c0_9, %c0_10] : memref<8x128xf32, #tpu.memory_space<vmem>>, vector<8x128xf32>
    %13 = arith.mulf %4, %4 : vector<128x128xf32>
    %cst_11 = arith.constant dense<0.000000e+00> : vector<8x128xf32>
    %14 = tpu.matmul %11, %13, %cst_11 {dimension_numbers = #tpu.dot_dimension_numbers<[1], [1], [0], [0], [0, 0, 1, 0], [], []>} : vector<8x128xf32>, vector<128x128xf32>, vector<8x128xf32> -> vector<8x128xf32>
    %15 = arith.addf %12, %14 : vector<8x128xf32>
    %c0_12 = arith.constant 0 : index
    %c0_13 = arith.constant 0 : index
    %16 = vector.load %arg8[%c0_12, %c0_13] : memref<8x128xf32, #tpu.memory_space<vmem>>, vector<8x128xf32>
    tpu.vector_store %arg8[%c0_12, %c0_13], %15 {strides = array<i32>} : memref<8x128xf32, #tpu.memory_space<vmem>>, vector<8x128xf32>,
    %c0_14 = arith.constant 0 : index
    %c0_15 = arith.constant 0 : index
    %17 = vector.load %arg6[%c0_14, %c0_15] : memref<8x128xf32, #tpu.memory_space<vmem>>, vector<8x128xf32>
    %cst_16 = arith.constant dense<0.000000e+00> : vector<8x128xf32>
    %18 = tpu.matmul %3, %4, %cst_16 {dimension_numbers = #tpu.dot_dimension_numbers<[1], [1], [0], [0], [0, 0, 1, 0], [], []>} : vector<8x128xf32>, vector<128x128xf32>, vector<8x128xf32> -> vector<8x128xf32>
    %19 = arith.addf %17, %18 : vector<8x128xf32>
    %c0_17 = arith.constant 0 : index
    %c0_18 = arith.constant 0 : index
    %20 = vector.load %arg6[%c0_17, %c0_18] : memref<8x128xf32, #tpu.memory_space<vmem>>, vector<8x128xf32>
    tpu.vector_store %arg6[%c0_17, %c0_18], %19 {strides = array<i32>} : memref<8x128xf32, #tpu.memory_space<vmem>>, vector<8x128xf32>,
    %c0_i32_19 = arith.constant 0 : i32
    %21 = arith.cmpi eq, %arg2, %c0_i32_19 : i32
    %22 = arith.extui %21 : i1 to i32
    %c0_i32_20 = arith.constant 0 : i32
    %23 = arith.cmpi ne, %22, %c0_i32_20 : i32
    scf.if %23 {
      %c0_21 = arith.constant 0 : index
      %c0_22 = arith.constant 0 : index
      %24 = vector.load %arg7[%c0_21, %c0_22] : memref<8x1xf32, #tpu.memory_space<vmem>>, vector<8x1xf32>
      %25 = math.sqrt %24 : vector<8x1xf32>
      %cst_23 = arith.constant 9.99999974E-5 : f32
      %26 = vector.broadcast %cst_23 : f32 to vector<8x1xf32>
      %27 = arith.addf %25, %26 : vector<8x1xf32>
      %28 = tpu.reciprocal %27 : vector<8x1xf32> -> vector<8x1xf32>
      %c0_24 = arith.constant 0 : index
      %c0_25 = arith.constant 0 : index
      %29 = vector.load %arg8[%c0_24, %c0_25] : memref<8x128xf32, #tpu.memory_space<vmem>>, vector<1x128xf32>
      %30 = math.sqrt %29 : vector<1x128xf32>
      %cst_26 = arith.constant 9.99999974E-5 : f32
      %31 = vector.broadcast %cst_26 : f32 to vector<1x128xf32>
      %32 = arith.addf %30, %31 : vector<1x128xf32>
      %33 = tpu.reciprocal %32 : vector<1x128xf32> -> vector<1x128xf32>
      %c0_27 = arith.constant 0 : index
      %c0_28 = arith.constant 0 : index
      %34 = vector.load %arg6[%c0_27, %c0_28] : memref<8x128xf32, #tpu.memory_space<vmem>>, vector<8x128xf32>
      %35 = vector.broadcast %28 : vector<8x1xf32> to vector<8x128xf32>
      %36 = arith.mulf %34, %35 : vector<8x128xf32>
      %37 = vector.broadcast %33 : vector<1x128xf32> to vector<8x128xf32>
      %38 = arith.mulf %36, %37 : vector<8x128xf32>
      %c0_29 = arith.constant 0 : index
      %c0_30 = arith.constant 0 : index
      %39 = vector.load %arg5[%c0_29, %c0_30] : memref<8x128xf32, #tpu.memory_space<vmem>>, vector<8x128xf32>
      tpu.vector_store %arg5[%c0_29, %c0_30], %38 {strides = array<i32>} : memref<8x128xf32, #tpu.memory_space<vmem>>, vector<8x128xf32>,
    } else {
    }
    return
  }
  func.func @transform_0(%arg0: i32, %arg1: i32, %arg2: i32) -> (i32, i32) {
    %c0_i32 = arith.constant 0 : i32
    return %arg0, %arg2 : i32, i32
  }
  func.func @transform_1(%arg0: i32, %arg1: i32, %arg2: i32) -> (i32, i32) {
    %c0_i32 = arith.constant 0 : i32
    return %arg1, %arg2 : i32, i32
  }
  func.func @transform_2(%arg0: i32, %arg1: i32, %arg2: i32) -> (i32, i32) {
    %c0_i32 = arith.constant 0 : i32
    return %arg0, %arg1 : i32, i32
  }
}

</mosaic_0001>

<bundles_post_ra>
// kernel: tpu_custom_call.1
= control target key start
LH: loop header
LB: loop body
LE: loop exit
PB: predicated region body
PF: predicated region fallthrough
CT: control target
= control target key end

     0   :  { %7 = vsyncpa [#allocation6], 0  ;;  %s547_s0 = inlined_call_operand.hbm [shape: f32[8,128], index: 0, kind: input, shape index: {}]   ;;  %s548_s1 = inlined_call_operand.hbm [shape: f32[128,128], index: 1, kind: input, shape index: {}]   ;;  %s549_s2 = inlined_call_operand.hbm [shape: f32[8,128], index: 2, kind: output, shape index: {}]  }
   0x1   :  { %8 = vsyncpa [#allocation9], 0 }
   0x2   :  { %9 = vsyncpa [#allocation7], 0  ;;  %s472_s9 = smov [#allocation5]   ;;  %s473_s11 = smov [#allocation8]  }
   0x3   :  { %s16_s10 = sshll.u32 %s472_s9, 4  ;;  %s25_s12 = sshll.u32 %s473_s11, 4  ;;  %s17_s10 = int_to_ptr.vmem [resolvable:$true] %s16_s10  ;;  %s26_s12 = int_to_ptr.vmem [resolvable:$true] %s25_s12 }
   0x4   :  { %s414_s13 = scalar_lea.vmem %s17_s10, 128  ;;  %p419_p1 = scmp.lt.s32.totalorder %s17_s10, %s17_s10 }
   0x5   :  { %p415_p0 = scmp.ne.s32.totalorder %s17_s10, %s414_s13  ;;  %p420_p2 = scmp.lt.s32.totalorder %s414_s13, %s414_s13 }
   0x7   :  { %p421_p3 = por %p420_p2, %p419_p1 }
   0x9   :  { %p422_p4 = pnand %p421_p3, %p415_p0 }
   0xb   :  { %425 = shalt.err (!%p422_p4)
}
   0xc   :  { %19 = dma.hbm_to_vmem [thread:$0]  %s547_s0, 128, %s17_s10, [#allocation6]  }
   0xd   :  { %s434_s16 = scalar_lea.vmem %s26_s12, 2048  ;;  %p439_p6 = scmp.lt.s32.totalorder %s26_s12, %s26_s12 }
   0xe   :  { %p435_p5 = scmp.ne.s32.totalorder %s26_s12, %s434_s16  ;;  %p440_p7 = scmp.lt.s32.totalorder %s434_s16, %s434_s16 }
  0x10   :  { %p441_p8 = por %p440_p7, %p439_p6 }
  0x12   :  { %p442_p9 = pnand %p441_p8, %p435_p5 }
  0x14   :  { %445 = shalt.err (!%p442_p9)
}
  0x15   :  { %s474_s17 = smov 128   ;;  %s475_s18 = smov 8  }
  0x16   :  { %31 = dma.hbm_to_vmem [thread:$0]  %s548_s1, 2048, %s26_s12, [#allocation9], %s474_s17, %s474_s17, %s475_s18  }
  0x17   :  { %466 = dma.done.wait [#allocation6], 128  }
  0x18   :  { %467 = vsyncadd [#allocation6], 4294967168 }
  0x19   :  { %468 = dma.done.wait [#allocation9], 2048  }
  0x1a   :  { %469 = vsyncadd [#allocation9], 4294965248  ;;  %vm43_vm0 = vcmask 7168   ;;  %v476_v0 = vmov 0.0   ;;  %vm477_vm1 = vmmov 0   ;;  %v62_v1 = vld [vmem:[#allocation8 + $0x78] sm:$0xff]  ;;  %v262_v59 = vlaneseq }
  0x1b   :  { %318 = vmatprep.subr.mxu0 %v476_v0  ;;  %353 = vmatprep.subr.mxu1 %v476_v0  ;;  %44 = vst.msk [vmem:[#allocation3] sm:$0xff] %vm43_vm0, %v476_v0  ;;  %v508_v2 = vld [vmem:[#allocation5] sm:$0xff]  ;;  %v61_v3 = vld [vmem:[#allocation8 + $0x70] sm:$0xff]  ;;  %v86_v4 = vmul.f32 %v62_v1, %v62_v1  ;;  %v60_v7 = vld [vmem:[#allocation8 + $0x68] sm:$0xff]  ;;  %v478_v18 = vmov 0   ;;  %v479_v36 = vmov 1.0  }
  0x1c   :  { %350 = vmatprep.mubr.msk.f32.mxu0 %vm477_vm1, %v476_v0  ;;  %385 = vmatprep.mubr.msk.f32.mxu1 %vm477_vm1, %v476_v0  ;;  %v64_v5 = vmul.f32 %v508_v2, %v508_v2  ;;  %v85_v6 = vmul.f32 %v61_v3, %v61_v3  ;;  %v84_v8 = vmul.f32 %v60_v7, %v60_v7  ;;  %v59_v9 = vld [vmem:[#allocation8 + $0x60] sm:$0xff]  ;;  %v58_v11 = vld [vmem:[#allocation8 + $0x58] sm:$0xff]  ;;  %v57_v13 = vld [vmem:[#allocation8 + $0x50] sm:$0xff]  ;;  %v263_v60 = vshrl.u32 %v262_v59, 7  ;;  %s480_s0 = smov [#allocation10]  }
  0x1d   :  { %354 = vmatpush3.xpose.msra.mxu1 %v62_v1  ;;  %319 = vmatpush3.xpose.msra.mxu0 %v86_v4  ;;  %v83_v10 = vmul.f32 %v59_v9, %v59_v9  ;;  %v82_v12 = vmul.f32 %v58_v11, %v58_v11  ;;  %v81_v14 = vmul.f32 %v57_v13, %v57_v13  ;;  %v56_v15 = vld [vmem:[#allocation8 + $0x48] sm:$0xff]  ;;  %v55_v17 = vld [vmem:[#allocation8 + $0x40] sm:$0xff]  ;;  %v54_v20 = vld [vmem:[#allocation8 + $0x38] sm:$0xff]  ;;  %s274_s1 = sshll.u32 %s480_s0, 4  ;;  %s275_s1 = int_to_ptr.vmem [resolvable:$true] %s274_s1 }
  0x1e   :  { %355 = vmatprep.subr.mxu1 %v476_v0  ;;  %65 = vadd.xlane.f32.xlu0 %v64_v5  ;;  %v80_v16 = vmul.f32 %v56_v15, %v56_v15  ;;  %v79_v19 = vmul.f32 %v55_v17, %v55_v17  ;;  %v78_v21 = vmul.f32 %v54_v20, %v54_v20  ;;  %v53_v22 = vld [vmem:[#allocation8 + $0x30] sm:$0xff]  ;;  %v52_v24 = vld [vmem:[#allocation8 + $0x28] sm:$0xff]  ;;  %v51_v26 = vld [vmem:[#allocation8 + $0x20] sm:$0xff]  ;;  %v264_v61 = vsub.s32 0, %v263_v60  ;;  %s446_s21 = scalar_lea.vmem %s275_s1, 128  ;;  %p451_p11 = scmp.lt.s32.totalorder %s275_s1, %s275_s1 }
  0x1f   :  { %320 = vmatprep.subr.mxu0 %v476_v0  ;;  %397 = vset.pattern.permute.xlu0 %v478_v18  ;;  %v77_v23 = vmul.f32 %v53_v22, %v53_v22  ;;  %v76_v25 = vmul.f32 %v52_v24, %v52_v24  ;;  %v75_v27 = vmul.f32 %v51_v26, %v51_v26  ;;  %v50_v28 = vld [vmem:[#allocation8 + $0x18] sm:$0xff]  ;;  %v49_v30 = vld [vmem:[#allocation8 + $0x10] sm:$0xff]  ;;  %v48_v32 = vld [vmem:[#allocation8 + $0x8] sm:$0xff]  ;;  %p447_p10 = scmp.ne.s32.totalorder %s275_s1, %s446_s21  ;;  %p452_p12 = scmp.lt.s32.totalorder %s446_s21, %s446_s21 }
  0x20   :  { %v74_v29 = vmul.f32 %v50_v28, %v50_v28  ;;  %v73_v31 = vmul.f32 %v49_v30, %v49_v30  ;;  %v72_v33 = vmul.f32 %v48_v32, %v48_v32  ;;  %v47_v34 = vld [vmem:[#allocation8] sm:$0xff] }
  0x21   :  { %356 = vmatpush3.xpose.msra.mxu1 %v61_v3  ;;  %321 = vmatpush3.xpose.msra.mxu0 %v85_v6  ;;  %v71_v35 = vmul.f32 %v47_v34, %v47_v34  ;;  %p453_p13 = por %p452_p12, %p451_p11 }
  0x22   :  { %357 = vmatprep.subr.mxu1 %v476_v0  ;;  %322 = vmatprep.subr.mxu0 %v476_v0  ;;  %v63_v37 = vld [vmem:[#allocation3] sm:$0xff] }
  0x23   :  { %p454_p0 = pnand %p453_p13, %p447_p10 }
  0x25   :  { %358 = vmatpush3.xpose.msra.mxu1 %v60_v7  ;;  %323 = vmatpush3.xpose.msra.mxu0 %v84_v8 }
  0x26   :  { %359 = vmatprep.subr.mxu1 %v476_v0  ;;  %324 = vmatprep.subr.mxu0 %v476_v0 }
  0x29   :  { %360 = vmatpush3.xpose.msra.mxu1 %v59_v9  ;;  %325 = vmatpush3.xpose.msra.mxu0 %v83_v10 }
  0x2a   :  { %361 = vmatprep.subr.mxu1 %v476_v0  ;;  %326 = vmatprep.subr.mxu0 %v476_v0 }
  0x2d   :  { %362 = vmatpush3.xpose.msra.mxu1 %v58_v11  ;;  %327 = vmatpush3.xpose.msra.mxu0 %v82_v12 }
  0x2e   :  { %363 = vmatprep.subr.mxu1 %v476_v0  ;;  %328 = vmatprep.subr.mxu0 %v476_v0 }
  0x31   :  { %364 = vmatpush3.xpose.msra.mxu1 %v57_v13  ;;  %329 = vmatpush3.xpose.msra.mxu0 %v81_v14 }
  0x32   :  { %365 = vmatprep.subr.mxu1 %v476_v0  ;;  %330 = vmatprep.subr.mxu0 %v476_v0 }
  0x35   :  { %366 = vmatpush3.xpose.msra.mxu1 %v56_v15  ;;  %331 = vmatpush3.xpose.msra.mxu0 %v80_v16 }
  0x36   :  { %367 = vmatprep.subr.mxu1 %v476_v0  ;;  %332 = vmatprep.subr.mxu0 %v476_v0 }
  0x39   :  { %368 = vmatpush3.xpose.msra.mxu1 %v55_v17  ;;  %333 = vmatpush3.xpose.msra.mxu0 %v79_v19 }
  0x3a   :  { %369 = vmatprep.subr.mxu1 %v476_v0  ;;  %334 = vmatprep.subr.mxu0 %v476_v0 }
  0x3d   :  { %370 = vmatpush3.xpose.msra.mxu1 %v54_v20  ;;  %335 = vmatpush3.xpose.msra.mxu0 %v78_v21 }
  0x3e   :  { %371 = vmatprep.subr.mxu1 %v476_v0  ;;  %336 = vmatprep.subr.mxu0 %v476_v0 }
  0x41   :  { %372 = vmatpush3.xpose.msra.mxu1 %v53_v22  ;;  %337 = vmatpush3.xpose.msra.mxu0 %v77_v23 }
  0x42   :  { %373 = vmatprep.subr.mxu1 %v476_v0  ;;  %338 = vmatprep.subr.mxu0 %v476_v0 }
  0x45   :  { %374 = vmatpush3.xpose.msra.mxu1 %v52_v24  ;;  %339 = vmatpush3.xpose.msra.mxu0 %v76_v25 }
  0x46   :  { %375 = vmatprep.subr.mxu1 %v476_v0  ;;  %340 = vmatprep.subr.mxu0 %v476_v0 }
  0x49   :  { %376 = vmatpush3.xpose.msra.mxu1 %v51_v26  ;;  %341 = vmatpush3.xpose.msra.mxu0 %v75_v27 }
  0x4a   :  { %377 = vmatprep.subr.mxu1 %v476_v0  ;;  %342 = vmatprep.subr.mxu0 %v476_v0 }
  0x4d   :  { %378 = vmatpush3.xpose.msra.mxu1 %v50_v28  ;;  %343 = vmatpush3.xpose.msra.mxu0 %v74_v29 }
  0x4e   :  { %379 = vmatprep.subr.mxu1 %v476_v0  ;;  %344 = vmatprep.subr.mxu0 %v476_v0 }
  0x51   :  { %380 = vmatpush3.xpose.msra.mxu1 %v49_v30  ;;  %345 = vmatpush3.xpose.msra.mxu0 %v73_v31 }
  0x52   :  { %381 = vmatprep.subr.mxu1 %v476_v0  ;;  %346 = vmatprep.subr.mxu0 %v476_v0 }
  0x55   :  { %382 = vmatpush3.xpose.msra.mxu1 %v48_v32  ;;  %347 = vmatpush3.xpose.msra.mxu0 %v72_v33 }
  0x56   :  { %383 = vmatprep.subr.mxu1 %v476_v0  ;;  %348 = vmatprep.subr.mxu0 %v476_v0 }
  0x59   :  { %384 = vmatpush3.xpose.msra.mxu1 %v47_v34  ;;  %349 = vmatpush3.xpose.msra.mxu0 %v71_v35 }
  0x5c   :  { %386 = vmatmul.mubr.f32.vlgmr.msra.gmra.mxu1 %v508_v2  ;;  %351 = vmatmul.mubr.f32.vlgmr.msra.gmra.mxu0 %v479_v36 }
  0xa7   :  { %v66_v38 = vpop.xlane.xlu0 %65 }
  0xa8   :  { %v67_v39 = vadd.f32 %v66_v38, %v63_v37 }
  0xaa   :  { %69 = vst.msk [vmem:[#allocation3] sm:$0xff] %vm43_vm0, %v67_v39 }
  0xb1   :  { %v235_v40 = vld [vmem:[#allocation3] sm:$0xff] }
  0xb2   :  { %398 = vrsqrt.f32 %v235_v40  ;;  %vm238_vm2 = vcmp.eq.f32.partialorder %v235_v40, inf  ;;  %v241_v43 = vand.u32 2147483648, %v235_v40  ;;  %vm240_vm3 = vcmp.eq.f32.partialorder %v235_v40, 0.0 }
  0xbf   :  { %v399_v41 = vpop.eup %398 }
  0xc0   :  { %v237_v42 = vmul.f32 %v399_v41, %v235_v40 }
  0xc2   :  { %v239_v44 = vsel %vm238_vm2, %v235_v40, %v237_v42 }
  0xc3   :  { %v242_v45 = vsel %vm240_vm3, %v241_v43, %v239_v44 }
  0xc4   :  { %v243_v46 = vadd.f32 0.0001, %v242_v45 }
  0xc6   :  { %400 = vrcp.f32 %v243_v46 }
  0xd3   :  { %v401_v47 = vpop.eup %400 }
  0xd4   :  { %258 = vperm.xlu0 %397, %v401_v47  }
 0x11c   :  { %v226_v48 = vpop.f32.mrf.mxu1  ;;  %v153_v49 = vpop.f32.mrf.mxu0 }
 0x11d   :  { %158 = vst [vmem:[#allocation4] sm:$0xff] %v153_v49 }
 0x11e   :  { %v387_v50 = vpop.f32.mrf.mxu1  ;;  %v352_v51 = vpop.f32.mrf.mxu0 }
 0x124   :  { %v245_v52 = vld [vmem:[#allocation4] sm:$0x1] }
 0x125   :  { %402 = vrsqrt.f32 %v245_v52  ;;  %vm248_vm4 = vcmp.eq.f32.partialorder %v245_v52, inf  ;;  %v251_v55 = vand.u32 2147483648, %v245_v52  ;;  %vm250_vm5 = vcmp.eq.f32.partialorder %v245_v52, 0.0 }
 0x132   :  { %v403_v53 = vpop.eup %402 }
 0x133   :  { %v247_v54 = vmul.f32 %v403_v53, %v245_v52 }
 0x135   :  { %v249_v56 = vsel %vm248_vm4, %v245_v52, %v247_v54 }
 0x136   :  { %v252_v57 = vsel %vm250_vm5, %v251_v55, %v249_v56 }
 0x137   :  { %v253_v58 = vadd.f32 0.0001, %v252_v57 }
 0x139   :  { %404 = vrcp.f32 %v253_v58 }
 0x146   :  { %v405_v62 = vpop.eup %404 }
 0x147   :  { %v265_v0 = vrot.slane %v405_v62, %v264_v61 }
 0x14f   :  { %v259_v63 = vpop.permute.xlu0 %258 }
 0x150   :  { %v261_v1 = vmul.f32 %v259_v63, %v226_v48 }
 0x152   :  { %v266_v2 = vmul.f32 %v265_v0, %v261_v1 }
 0x154   :  { %267 = vst [vmem:[#allocation10] sm:$0xff] %v266_v2 }
 0x155   :  { %457 = shalt.err (!%p454_p0)
}
 0x156   :  { %277 = dma.vmem_to_hbm [thread:$0]  %s275_s1, 128, %s549_s2, [#allocation7]  }
 0x157   :  { %470 = dma.done.wait [#allocation7], 128  }
 0x158   :  { %471 = vsyncadd [#allocation7], 4294967168 }
 0x159   :  { %281 = vsyncpa [#allocation6], 1 }
 0x15a   :  { %282 = vsyncpa [#allocation9], 1 }
 0x15b   :  { %283 = vsyncpa [#allocation7], 1 }

</bundles_post_ra>
